<compile_context>
chip_gen: v7x
topology: tpu7x:2x2x1
jax: 0.10.0
libtpu: 0.0.40
codegen_flags: <defaults>
</compile_context>

<pallas_src>
import functools

import jax
import jax.numpy as jnp
from jax.experimental import pallas as pl
from jax.experimental.pallas import tpu as pltpu

_LANES = 128
_SUBLANES = 8
_EPS = 1e-8


def _round_up(x, m):
    return ((x + m - 1) // m) * m


def _pick_max_block_rows():
    """Per-generation block-row cap based on VMEM capacity."""
    try:
        info = pltpu.get_tpu_info()
        vmem = int(getattr(info, "vmem_capacity_bytes", 64 << 20))
    except Exception:
        vmem = 64 << 20
    # ~8 MiB f32 input blocks on 128 MiB-VMEM chips (v5e/v6e), ~4 MiB on v7x.
    return 16384 if vmem >= (96 << 20) else 8192


def _choose_block_rows(rows, max_rows):
    """Largest block (multiple of 8, <= max_rows); prefer a divisor of `rows`
    so no grid step needs the ragged-row mask."""
    rows8 = _round_up(rows, _SUBLANES)
    bmax = min(_round_up(max_rows, _SUBLANES), rows8)
    bmax = max(bmax, _SUBLANES)
    if rows % _SUBLANES == 0 and rows > 0:
        lo = max(_SUBLANES, (bmax // 2) - ((bmax // 2) % _SUBLANES))
        for cand in range(bmax, lo - 1, -_SUBLANES):
            if rows % cand == 0:
                return cand
    return bmax


def _soft_iou_block_kernel(p_ref, l_ref, num_ref, den_ref, *,
                           from_sigmoid, ignore_label, total_rows,
                           block_rows, num_blocks):
    """One grid step: reduce a (block_rows, 128) tile to (8, 128) partials."""
    i = pl.program_id(0)

    p = p_ref[...].astype(jnp.float32)
    l = l_ref[...].astype(jnp.float32)
    if from_sigmoid:
        p = jax.nn.sigmoid(p)
    keep = l != jnp.float32(ignore_label)

    def emit(mask):
        pm = jnp.where(mask, p, jnp.float32(0.0))
        lm = jnp.where(mask, l, jnp.float32(0.0))
        # Group whole vregs (8 sublanes x 128 lanes) and add them: pure VPU,
        # no cross-lane reductions, no block-sized scratch accumulators.
        num_ref[0] = jnp.sum((pm * lm).reshape(-1, _SUBLANES, _LANES), axis=0)
        den_ref[0] = jnp.sum(
            jnp.maximum(pm, lm).reshape(-1, _SUBLANES, _LANES), axis=0)

    def masked_keep():
        # Neutralize rows read past the end of the (rows, 128) array.
        row = jax.lax.broadcasted_iota(jnp.int32, p.shape, 0) + i * block_rows
        return keep & (row < total_rows)

    ragged = (total_rows % block_rows) != 0
    if not ragged:
        emit(keep)
    elif num_blocks == 1:
        emit(masked_keep())
    else:
        last = num_blocks - 1

        @pl.when(i != last)
        def _():
            emit(keep)

        @pl.when(i == last)
        def _():
            emit(masked_keep())


def soft_iou(pred, label, from_sigmoid=False, ignore_label=-1,
             max_block_rows=None):
    """Pallas TPU implementation of softIou(pred, label, from_sigmoid, ignore_label)."""
    pred = jnp.asarray(pred)
    label = jnp.asarray(label).reshape(pred.shape)
    ign = float(ignore_label)
    n = int(pred.size)

    p_flat = pred.reshape(-1)
    l_flat = label.reshape(-1)

    rows = n // _LANES
    n_main = rows * _LANES

    # <128-element tail (sizes not a multiple of 128): reduce in plain JAX,
    # avoiding a full-array pad/copy of both tensors.
    tail_num = jnp.float32(0.0)
    tail_den = jnp.float32(0.0)
    if n_main != n:
        # TODO(synk): the offset-0 prefix slice below may still materialize a
        # copy in XLA; only paid when n is not a multiple of 128.
        pt = p_flat[n_main:].astype(jnp.float32)
        lt = l_flat[n_main:].astype(jnp.float32)
        if from_sigmoid:
            pt = jax.nn.sigmoid(pt)
        keep_t = lt != jnp.float32(ign)
        ptm = jnp.where(keep_t, pt, jnp.float32(0.0))
        ltm = jnp.where(keep_t, lt, jnp.float32(0.0))
        tail_num = jnp.sum(ptm * ltm)
        tail_den = jnp.sum(jnp.maximum(ptm, ltm))
        p_flat = p_flat[:n_main]
        l_flat = l_flat[:n_main]

    if rows == 0:
        # Tiny input: nothing left for the kernel.
        return jnp.float32(1.0) - tail_num / (tail_den + jnp.float32(_EPS))

    # Lane-dense (rows, 128) views: contiguous reshapes, no copies.
    p2 = p_flat.reshape(rows, _LANES)
    l2 = l_flat.reshape(rows, _LANES)

    max_rows = max_block_rows if max_block_rows is not None else _pick_max_block_rows()
    block_rows = _choose_block_rows(rows, max_rows)
    num_blocks = -(-rows // block_rows)

    # 2 inputs x 2 pipeline buffers x block + slack for the tiny outputs.
    in_itemsize = pred.dtype.itemsize + label.dtype.itemsize
    vmem_limit = int(2 * block_rows * _LANES * in_itemsize + (4 << 20))

    kernel = functools.partial(
        _soft_iou_block_kernel,
        from_sigmoid=bool(from_sigmoid),
        ignore_label=ign,
        total_rows=rows,
        block_rows=block_rows,
        num_blocks=num_blocks,
    )

    num_parts, den_parts = pl.pallas_call(
        kernel,
        out_shape=(
            jax.ShapeDtypeStruct((num_blocks, _SUBLANES, _LANES), jnp.float32),
            jax.ShapeDtypeStruct((num_blocks, _SUBLANES, _LANES), jnp.float32),
        ),
        grid=(num_blocks,),
        in_specs=[
            pl.BlockSpec((block_rows, _LANES), lambda i: (i, 0)),
            pl.BlockSpec((block_rows, _LANES), lambda i: (i, 0)),
        ],
        out_specs=(
            pl.BlockSpec((1, _SUBLANES, _LANES), lambda i: (i, 0, 0)),
            pl.BlockSpec((1, _SUBLANES, _LANES), lambda i: (i, 0, 0)),
        ),
        compiler_params=pltpu.CompilerParams(
            dimension_semantics=("parallel",),
            vmem_limit_bytes=vmem_limit,
        ),
    )(p2, l2)

    num = jnp.sum(num_parts) + tail_num
    den = jnp.sum(den_parts) + tail_den + jnp.float32(_EPS)
    return jnp.float32(1.0) - num / den


def _soft_iou_ref(pred, label, from_sigmoid=False, ignore_label=-1):
    # Pure-JAX reference mirroring the PyTorch softIou.
    pred = jnp.asarray(pred, jnp.float32)
    if from_sigmoid:
        pred = jax.nn.sigmoid(pred)
    label = jnp.asarray(label, jnp.float32).reshape(pred.shape)
    w = (label != ignore_label).astype(jnp.float32)
    num = jnp.sum(pred * label * w)
    den = jnp.sum(jnp.maximum(pred, label) * w) + 1e-8
    return 1.0 - num / den


def _make_inputs(key, shape):
    k1, k2, k3 = jax.random.split(key, 3)
    logits = jax.random.normal(k1, shape, dtype=jnp.float32)
    label = (jax.random.uniform(k2, shape) > 0.5).astype(jnp.float32)
    # Sprinkle some ignored pixels (-1) to exercise the sample_weight mask.
    ignore_mask = jax.random.uniform(k3, shape) > 0.9
    label = jnp.where(ignore_mask, jnp.float32(-1.0), label)
    return logits, label


if __name__ == "__main__":
    key = jax.random.PRNGKey(0)
    keys = jax.random.split(key, 4)

    # 1) Small (b, h, w) case, pred already a probability (single masked block).
    logits, label = _make_inputs(keys[0], (2, 16, 16))
    pred = jax.nn.sigmoid(logits)
    out = jax.block_until_ready(soft_iou(pred, label, from_sigmoid=False, ignore_label=-1))
    ref = _soft_iou_ref(pred, label, from_sigmoid=False, ignore_label=-1)
    assert jnp.allclose(out, ref, rtol=1e-5, atol=1e-5), (out, ref)

    # 2) from_sigmoid=True path (sigmoid applied inside the kernel).
    out_s = jax.block_until_ready(soft_iou(logits, label, from_sigmoid=True, ignore_label=-1))
    ref_s = _soft_iou_ref(logits, label, from_sigmoid=True, ignore_label=-1)
    assert jnp.allclose(out_s, ref_s, rtol=1e-5, atol=1e-5), (out_s, ref_s)

    # 3) Larger, 128-aligned case (divisor-sized blocks, no mask, no pad).
    logits_m, label_m = _make_inputs(keys[1], (4, 512, 640))
    pred_m = jax.nn.sigmoid(logits_m)
    out_m = jax.block_until_ready(soft_iou(pred_m, label_m, from_sigmoid=False, ignore_label=-1))
    ref_m = _soft_iou_ref(pred_m, label_m, from_sigmoid=False, ignore_label=-1)
    assert jnp.allclose(out_m, ref_m, rtol=1e-4, atol=1e-5), (out_m, ref_m)

    # 4) Misaligned size: multi-block parallel grid, ragged (masked) last
    #    block, plus a <128-element tail reduced in plain JAX.
    logits_r, label_r = _make_inputs(keys[2], (2, 100, 100))
    pred_r = jax.nn.sigmoid(logits_r)
    out_r = jax.block_until_ready(soft_iou(pred_r, label_r, from_sigmoid=False,
                                           ignore_label=-1, max_block_rows=64))
    ref_r = _soft_iou_ref(pred_r, label_r, from_sigmoid=False, ignore_label=-1)
    assert jnp.allclose(out_r, ref_r, rtol=1e-4, atol=1e-5), (out_r, ref_r)

    # 5) Tiny input (< 128 elements): pure-JAX fallback path.
    logits_t, label_t = _make_inputs(keys[3], (5, 5))
    out_t = jax.block_until_ready(soft_iou(logits_t, label_t, from_sigmoid=True, ignore_label=-1))
    ref_t = _soft_iou_ref(logits_t, label_t, from_sigmoid=True, ignore_label=-1)
    assert jnp.allclose(out_t, ref_t, rtol=1e-5, atol=1e-5), (out_t, ref_t)

    print("KERNEL_OK")
</pallas_src>

<mosaic_0001>
module attributes {stable_mosaic.version = 11 : i64} {
  func.func @_soft_iou_block_kernel(%arg0: i32, %arg1: memref<8x128xf32, #tpu.memory_space<vmem>>, %arg2: memref<8x128xf32, #tpu.memory_space<vmem>>, %arg3: memref<1x8x128xf32, #tpu.memory_space<vmem>>, %arg4: memref<1x8x128xf32, #tpu.memory_space<vmem>>) attributes {dimension_semantics = [#tpu.dimension_semantics<parallel>], iteration_bounds = array<i64: 1>, scalar_prefetch = 0 : i64, scratch_operands = 0 : i64, tpu.core_type = #tpu.core_type<tc>, window_params = [{transform_indices = @transform_0, window_bounds = array<i64: 8, 128>}, {transform_indices = @transform_1, window_bounds = array<i64: 8, 128>}, {transform_indices = @transform_2, window_bounds = array<i64: 1, 8, 128>}, {transform_indices = @transform_3, window_bounds = array<i64: 1, 8, 128>}]} {
    %c0 = arith.constant 0 : index
    %c0_0 = arith.constant 0 : index
    %0 = vector.load %arg1[%c0, %c0_0] : memref<8x128xf32, #tpu.memory_space<vmem>>, vector<8x128xf32>
    %c0_1 = arith.constant 0 : index
    %c0_2 = arith.constant 0 : index
    %1 = vector.load %arg2[%c0_1, %c0_2] : memref<8x128xf32, #tpu.memory_space<vmem>>, vector<8x128xf32>
    %cst = arith.constant -1.000000e+00 : f32
    %2 = vector.broadcast %cst : f32 to vector<8x128xf32>
    %3 = arith.cmpf one, %1, %2 : vector<8x128xf32>
    %4 = tpu.iota {dimensions = array<i32: 0>} : vector<8x128xi32>
    %c8_i32 = arith.constant 8 : i32
    %5 = arith.muli %arg0, %c8_i32 : i32
    %6 = vector.broadcast %5 : i32 to vector<8x128xi32>
    %7 = arith.addi %4, %6 : vector<8x128xi32>
    %c4_i32 = arith.constant 4 : i32
    %8 = vector.broadcast %c4_i32 : i32 to vector<8x128xi32>
    %9 = arith.cmpi slt, %7, %8 : vector<8x128xi32>
    %10 = arith.andi %3, %9 : vector<8x128xi1>
    %cst_3 = arith.constant 0.000000e+00 : f32
    %11 = vector.broadcast %cst_3 : f32 to vector<8x128xf32>
    %12 = arith.select %10, %0, %11 : vector<8x128xi1>, vector<8x128xf32>
    %cst_4 = arith.constant 0.000000e+00 : f32
    %13 = vector.broadcast %cst_4 : f32 to vector<8x128xf32>
    %14 = arith.select %10, %1, %13 : vector<8x128xi1>, vector<8x128xf32>
    %15 = arith.mulf %12, %14 : vector<8x128xf32>
    %16 = vector.shape_cast %15 : vector<8x128xf32> to vector<1x8x128xf32>
    %cst_5 = arith.constant dense<0.000000e+00> : vector<8x128xf32>
    %17 = vector.multi_reduction <add>, %16, %cst_5 [0] : vector<1x8x128xf32> to vector<8x128xf32>
    %c0_6 = arith.constant 0 : index
    %c0_7 = arith.constant 0 : index
    %c0_8 = arith.constant 0 : index
    %18 = vector.load %arg3[%c0_6, %c0_7, %c0_8] : memref<1x8x128xf32, #tpu.memory_space<vmem>>, vector<1x8x128xf32>
    %19 = vector.shape_cast %18 : vector<1x8x128xf32> to vector<8x128xf32>
    %20 = vector.shape_cast %17 : vector<8x128xf32> to vector<1x8x128xf32>
    tpu.vector_store %arg3[%c0_6, %c0_7, %c0_8], %20 {strides = array<i32>} : memref<1x8x128xf32, #tpu.memory_space<vmem>>, vector<1x8x128xf32>,
    %21 = arith.maximumf %12, %14 : vector<8x128xf32>
    %22 = vector.shape_cast %21 : vector<8x128xf32> to vector<1x8x128xf32>
    %cst_9 = arith.constant dense<0.000000e+00> : vector<8x128xf32>
    %23 = vector.multi_reduction <add>, %22, %cst_9 [0] : vector<1x8x128xf32> to vector<8x128xf32>
    %c0_10 = arith.constant 0 : index
    %c0_11 = arith.constant 0 : index
    %c0_12 = arith.constant 0 : index
    %24 = vector.load %arg4[%c0_10, %c0_11, %c0_12] : memref<1x8x128xf32, #tpu.memory_space<vmem>>, vector<1x8x128xf32>
    %25 = vector.shape_cast %24 : vector<1x8x128xf32> to vector<8x128xf32>
    %26 = vector.shape_cast %23 : vector<8x128xf32> to vector<1x8x128xf32>
    tpu.vector_store %arg4[%c0_10, %c0_11, %c0_12], %26 {strides = array<i32>} : memref<1x8x128xf32, #tpu.memory_space<vmem>>, vector<1x8x128xf32>,
    return
  }
  func.func @transform_0(%arg0: i32) -> (i32, i32) {
    %c0_i32 = arith.constant 0 : i32
    %c0_i32_0 = arith.constant 0 : i32
    return %arg0, %c0_i32 : i32, i32
  }
  func.func @transform_1(%arg0: i32) -> (i32, i32) {
    %c0_i32 = arith.constant 0 : i32
    %c0_i32_0 = arith.constant 0 : i32
    return %arg0, %c0_i32 : i32, i32
  }
  func.func @transform_2(%arg0: i32) -> (i32, i32, i32) {
    %c0_i32 = arith.constant 0 : i32
    %c0_i32_0 = arith.constant 0 : i32
    %c0_i32_1 = arith.constant 0 : i32
    return %arg0, %c0_i32, %c0_i32_0 : i32, i32, i32
  }
  func.func @transform_3(%arg0: i32) -> (i32, i32, i32) {
    %c0_i32 = arith.constant 0 : i32
    %c0_i32_0 = arith.constant 0 : i32
    %c0_i32_1 = arith.constant 0 : i32
    return %arg0, %c0_i32, %c0_i32_0 : i32, i32, i32
  }
}

</mosaic_0001>

<bundles_post_ra>
// kernel: tpu_custom_call.1
= control target key start
LH: loop header
LB: loop body
LE: loop exit
PB: predicated region body
PF: predicated region fallthrough
CT: control target
= control target key end

     0   :  { %9 = vsyncpa [#allocation3], 0  ;;  %s267_s0 = inlined_call_operand.hbm [shape: f32[4,128], index: 0, kind: input, shape index: {}]   ;;  %s268_s1 = inlined_call_operand.hbm [shape: f32[4,128], index: 1, kind: input, shape index: {}]   ;;  %s269_s2 = inlined_call_operand.hbm [shape: f32[1,8,128], index: 2, kind: output, shape index: {0}]   ;;  %s270_s3 = inlined_call_operand.hbm [shape: f32[1,8,128], index: 3, kind: output, shape index: {1}]  }
   0x1   :  { %10 = vsyncpa [#allocation6], 0 }
   0x2   :  { %11 = vsyncpa [#allocation4], 0 }
   0x3   :  { %12 = vsyncpa [#allocation9], 0 }
   0x4   :  { %17 = vsyncadd [#allocation3], 64  ;;  %s193_s12 = smov [#allocation2]   ;;  %s97_s16 = scalar_lea.hbm %s267_s0, 64 }
   0x5   :  { %s18_s13 = sshll.u32 %s193_s12, 4  ;;  %p98_p0 = scmp.ne.s32.totalorder %s267_s0, %s97_s16  ;;  %s19_s13 = int_to_ptr.vmem [resolvable:$true] %s18_s13 }
   0x6   :  { %p101_p1 = scmp.lt.u32.totalorder %s97_s16, %s267_s0 }
   0x8   :  { %p103_p2 = pnand %p101_p1, %p98_p0 }
   0xa   :  { %106 = shalt.err (!%p103_p2)
}
   0xb   :  { %s107_s21 = scalar_lea.vmem %s19_s13, 64  ;;  %s111_s22 = scalar_lea.vmem %s19_s13, 128 }
   0xc   :  { %p108_p3 = scmp.ne.s32.totalorder %s19_s13, %s107_s21  ;;  %p112_p4 = scmp.lt.s32.totalorder %s19_s13, %s19_s13 }
   0xd   :  { %p113_p5 = scmp.lt.s32.totalorder %s111_s22, %s107_s21 }
   0xf   :  { %p114_p6 = por %p113_p5, %p112_p4 }
  0x11   :  { %p115_p7 = pnand %p114_p6, %p108_p3 }
  0x13   :  { %118 = shalt.err (!%p115_p7)
}
  0x14   :  { %s194_s23 = smov 64   ;;  %s195_s24 = smov 4  }
  0x15   :  { %24 = dma.hbm_to_vmem [thread:$0]  %s267_s0, 64, %s19_s13, [#allocation3], %s194_s23, %s194_s23, %s195_s24  }
  0x16   :  { %29 = vsyncadd [#allocation6], 64  ;;  %s196_s27 = smov [#allocation5]   ;;  %s119_s4 = scalar_lea.hbm %s268_s1, 64 }
  0x17   :  { %s30_s28 = sshll.u32 %s196_s27, 4  ;;  %p120_p8 = scmp.ne.s32.totalorder %s268_s1, %s119_s4  ;;  %s31_s28 = int_to_ptr.vmem [resolvable:$true] %s30_s28 }
  0x18   :  { %p123_p9 = scmp.lt.u32.totalorder %s119_s4, %s268_s1 }
  0x1a   :  { %p125_p10 = pnand %p123_p9, %p120_p8 }
  0x1c   :  { %128 = shalt.err (!%p125_p10)
}
  0x1d   :  { %s129_s9 = scalar_lea.vmem %s31_s28, 64  ;;  %s133_s0 = scalar_lea.vmem %s31_s28, 128 }
  0x1e   :  { %p130_p11 = scmp.ne.s32.totalorder %s31_s28, %s129_s9  ;;  %p134_p12 = scmp.lt.s32.totalorder %s31_s28, %s31_s28 }
  0x1f   :  { %p135_p13 = scmp.lt.s32.totalorder %s133_s0, %s129_s9 }
  0x21   :  { %p136_p0 = por %p135_p13, %p134_p12 }
  0x23   :  { %p137_p1 = pnand %p136_p0, %p130_p11 }
  0x25   :  { %140 = shalt.err (!%p137_p1)
}
  0x26   :  { %36 = dma.hbm_to_vmem [thread:$0]  %s268_s1, 64, %s31_s28, [#allocation6], %s194_s23, %s194_s23, %s195_s24  }
  0x27   :  { %185 = dma.done.wait [#allocation3], 128  }
  0x28   :  { %186 = vsyncadd [#allocation3], 4294967168 }
  0x29   :  { %187 = dma.done.wait [#allocation6], 128  }
  0x2a   :  { %188 = vsyncadd [#allocation6], 4294967168  ;;  %v46_v0 = vlaneseq  ;;  %v43_v2 = vld [vmem:[#allocation2] sm:$0xff]  ;;  %v44_v3 = vld [vmem:[#allocation5] sm:$0xff]  ;;  %s197_s12 = smov [#allocation7]   ;;  %s198_s14 = smov [#allocation8]  }
  0x2b   :  { %vm45_vm1 = vcmp.ne.f32.partialorder %v44_v3, -1.0  ;;  %s67_s13 = sshll.u32 %s197_s12, 4  ;;  %s77_s15 = sshll.u32 %s198_s14, 4  ;;  %s68_s13 = int_to_ptr.vmem [resolvable:$true] %s67_s13  ;;  %s78_s15 = int_to_ptr.vmem [resolvable:$true] %s77_s15 }
  0x2c   :  { %v47_v1 = vshrl.u32 %v46_v0, 7  ;;  %s141_s1 = scalar_lea.vmem %s68_s13, 128  ;;  %p146_p3 = scmp.lt.s32.totalorder %s68_s13, %s68_s13 }
  0x2d   :  { %p142_p2 = scmp.ne.s32.totalorder %s68_s13, %s141_s1  ;;  %p147_p4 = scmp.lt.s32.totalorder %s141_s1, %s141_s1 }
  0x2e   :  { %vm51_vm0 = vcmp.lt.s32.totalorder %v47_v1, 4 }
  0x2f   :  { %vm52_vm2 = vmand %vm45_vm1, %vm51_vm0  ;;  %p148_p5 = por %p147_p4, %p146_p3 }
  0x30   :  { %v53_v4 = vsel %vm52_vm2, %v43_v2, 0.0  ;;  %v54_v5 = vsel %vm52_vm2, %v44_v3, 0.0 }
  0x31   :  { %v55_v6 = vmul.f32 %v54_v5, %v53_v4  ;;  %v58_v7 = vmax.f32 %v53_v4, %v54_v5  ;;  %p149_p6 = pnand %p148_p5, %p142_p2 }
  0x33   :  { %57 = vst [vmem:[#allocation7] sm:$0xff] %v55_v6  ;;  %60 = vst [vmem:[#allocation8] sm:$0xff] %v58_v7 }
  0x34   :  { %152 = shalt.err (!%p149_p6)
}
  0x35   :  { %s153_s18 = scalar_lea.hbm %s269_s2, 128 }
  0x36   :  { %p154_p7 = scmp.ne.s32.totalorder %s269_s2, %s153_s18  ;;  %p157_p8 = scmp.lt.u32.totalorder %s153_s18, %s269_s2 }
  0x38   :  { %p159_p9 = pnand %p157_p8, %p154_p7 }
  0x3a   :  { %162 = shalt.err (!%p159_p9)
}
  0x3b   :  { %70 = dma.vmem_to_hbm [thread:$0]  %s68_s13, 128, %s269_s2, [#allocation4]  }
  0x3c   :  { %s163_s25 = scalar_lea.vmem %s78_s15, 128  ;;  %p168_p11 = scmp.lt.s32.totalorder %s78_s15, %s78_s15 }
  0x3d   :  { %p164_p10 = scmp.ne.s32.totalorder %s78_s15, %s163_s25  ;;  %p169_p12 = scmp.lt.s32.totalorder %s163_s25, %s163_s25 }
  0x3f   :  { %p170_p13 = por %p169_p12, %p168_p11 }
  0x41   :  { %p171_p0 = pnand %p170_p13, %p164_p10 }
  0x43   :  { %174 = shalt.err (!%p171_p0)
}
  0x44   :  { %s175_s28 = scalar_lea.hbm %s270_s3, 128 }
  0x45   :  { %p176_p1 = scmp.ne.s32.totalorder %s270_s3, %s175_s28  ;;  %p179_p2 = scmp.lt.u32.totalorder %s175_s28, %s270_s3 }
  0x47   :  { %p181_p3 = pnand %p179_p2, %p176_p1 }
  0x49   :  { %184 = shalt.err (!%p181_p3)
}
  0x4a   :  { %80 = dma.vmem_to_hbm [thread:$0]  %s78_s15, 128, %s270_s3, [#allocation9]  }
  0x4b   :  { %189 = dma.done.wait [#allocation4], 128  }
  0x4c   :  { %190 = vsyncadd [#allocation4], 4294967168 }
  0x4d   :  { %191 = dma.done.wait [#allocation9], 128  }
  0x4e   :  { %192 = vsyncadd [#allocation9], 4294967168 }
  0x4f   :  { %87 = vsyncpa [#allocation3], 1 }
  0x50   :  { %88 = vsyncpa [#allocation6], 1 }
  0x51   :  { %89 = vsyncpa [#allocation4], 1 }
  0x52   :  { %90 = vsyncpa [#allocation9], 1 }

</bundles_post_ra>
